<compile_context>
chip_gen: v5e
topology: v5e:2x2
jax: 0.10.0
libtpu: 0.0.40
codegen_flags: <defaults>
</compile_context>

<pallas_src>
import math

import jax
import jax.numpy as jnp
from jax.experimental import pallas as pl
from jax.experimental.pallas import tpu as pltpu


def timestep_embedder_kernel(t_ref, freqs_ref, w1c_ref, w1s_ref, b1_ref, w2_ref, b2_ref, out_ref):
    # t_ref:     (TN, 1)        f32   (one batch tile)
    # freqs_ref: (1, half)      f32
    # w1c_ref:   (half, Hp)     bf16  (cos half of transposed Linear-1 weight, Hp = padded hidden)
    # w1s_ref:   (half, Hp)     bf16  (sin half)
    # b1_ref:    (1, Hp)        f32
    # w2_ref:    (Hp, Hp)       bf16  (transposed Linear-2 weight)
    # b2_ref:    (1, Hp)        f32
    # out_ref:   (TN, Hp)       f32
    t = t_ref[...]                                   # (TN, 1)
    args = t * freqs_ref[...]                        # (TN, half): single VPU broadcast-mul per tile

    compute_dtype = w1c_ref.dtype                    # bf16 (or f32 if caller kept f32 weights)
    cos_a = jnp.cos(args).astype(compute_dtype)      # cos/sin evaluated in f32 on the EUP
    sin_a = jnp.sin(args).astype(compute_dtype)

    # First Linear: split-weight matmul replaces concat([cos, sin]) @ W1.  f32 accumulation.
    h = (jnp.dot(cos_a, w1c_ref[...], preferred_element_type=jnp.float32)
         + jnp.dot(sin_a, w1s_ref[...], preferred_element_type=jnp.float32)
         + b1_ref[...])

    # SiLU in f32.
    h = h * jax.nn.sigmoid(h)

    # Second Linear.
    out = jnp.dot(h.astype(w2_ref.dtype), w2_ref[...],
                  preferred_element_type=jnp.float32) + b2_ref[...]
    out_ref[...] = out.astype(out_ref.dtype)


def _pad_to(x, shape):
    pads = [(0, s - d) for d, s in zip(x.shape, shape)]
    if any(p[1] for p in pads):
        return jnp.pad(x, pads)
    return x


def timestep_embedder(t, params, frequency_embedding_size=256, max_period=10000, block_n=256):
    """t: (N,) float array.  Returns (N, hidden_size) float32."""
    assert frequency_embedding_size % 2 == 0, "odd frequency_embedding_size not supported"
    # TODO(synk): odd frequency_embedding_size zero-padding branch not implemented (spec uses 256).

    N = int(t.shape[0])
    half = frequency_embedding_size // 2
    H = int(params["w2"].shape[1])
    H_pad = ((H + 127) // 128) * 128                 # lane-dense output feature dim

    # Sinusoidal frequencies (tiny, kept as a VMEM input).
    freqs = jnp.exp(
        -math.log(max_period) * jnp.arange(half, dtype=jnp.float32) / half
    ).reshape(1, half)

    # Split w1 into cos/sin halves and pad the output feature dim; biases stay f32.
    w1 = params["w1"]
    w1c = _pad_to(w1[:half], (half, H_pad))
    w1s = _pad_to(w1[half:], (half, H_pad))
    w2p = _pad_to(params["w2"], (H_pad, H_pad))
    b1p = _pad_to(params["b1"].astype(jnp.float32), (1, H_pad))
    b2p = _pad_to(params["b2"].astype(jnp.float32), (1, H_pad))

    # Batch tiling: TN is a multiple of 8 (sublane); pad N up to a multiple of TN.
    tn = block_n if N >= block_n else ((N + 7) // 8) * 8
    n_pad = ((N + tn - 1) // tn) * tn
    t2d = jnp.zeros((n_pad, 1), jnp.float32).at[:N, 0].set(t.astype(jnp.float32))
    grid = (n_pad // tn,)

    # Scheduler hints.
    weight_bytes = sum(int(x.size) * x.dtype.itemsize
                       for x in (freqs, w1c, w1s, b1p, w2p, b2p))
    flops = int(2 * n_pad * (frequency_embedding_size * H_pad + H_pad * H_pad))
    transcendentals = int(n_pad * (2 * half + H_pad))   # cos, sin, sigmoid
    bytes_accessed = int(t2d.size) * 4 + weight_bytes + n_pad * H_pad * 4
    # Double-buffered resident weights + streamed t/out tiles, with margin; bounded so it is safe
    # on every generation (v5e scoped default is 16 MiB, v7x physical VMEM is 64 MiB).
    vmem_needed = 2 * weight_bytes + 2 * (tn * 1 + tn * H_pad) * 4 + (2 << 20)
    vmem_limit = int(min(max(vmem_needed, 32 * 1024 * 1024), 64 * 1024 * 1024))

    out_padded = pl.pallas_call(
        timestep_embedder_kernel,
        out_shape=jax.ShapeDtypeStruct((n_pad, H_pad), jnp.float32),
        grid=grid,
        in_specs=[
            pl.BlockSpec((tn, 1), lambda i: (i, 0)),          # t tile (streamed)
            pl.BlockSpec((1, half), lambda i: (0, 0)),        # freqs (resident)
            pl.BlockSpec((half, H_pad), lambda i: (0, 0)),    # w1 cos-half (resident)
            pl.BlockSpec((half, H_pad), lambda i: (0, 0)),    # w1 sin-half (resident)
            pl.BlockSpec((1, H_pad), lambda i: (0, 0)),       # b1 (resident)
            pl.BlockSpec((H_pad, H_pad), lambda i: (0, 0)),   # w2 (resident)
            pl.BlockSpec((1, H_pad), lambda i: (0, 0)),       # b2 (resident)
        ],
        out_specs=pl.BlockSpec((tn, H_pad), lambda i: (i, 0)),
        compiler_params=pltpu.CompilerParams(
            dimension_semantics=("parallel",),                # batch axis -> v7x megacore
            vmem_limit_bytes=vmem_limit,
        ),
        cost_estimate=pl.CostEstimate(
            flops=flops,
            transcendentals=transcendentals,
            bytes_accessed=bytes_accessed,
        ),
    )(t2d, freqs, w1c, w1s, b1p, w2p, b2p)

    return out_padded[:N, :H]


def make_params(key, hidden_size, frequency_embedding_size=256, weight_dtype=jnp.bfloat16):
    """Deterministic synthetic parameters, stored as (in, out) so the kernel does x @ W + b.

    Weights in bf16 (native MXU datapath, half the HBM traffic); biases in f32.
    """
    k1, k2, k3, k4 = jax.random.split(key, 4)
    f = frequency_embedding_size
    h = hidden_size
    return {
        "w1": (jax.random.normal(k1, (f, h), dtype=jnp.float32) * 0.02).astype(weight_dtype),
        "b1": jax.random.normal(k2, (1, h), dtype=jnp.float32) * 0.02,
        "w2": (jax.random.normal(k3, (h, h), dtype=jnp.float32) * 0.02).astype(weight_dtype),
        "b2": jax.random.normal(k4, (1, h), dtype=jnp.float32) * 0.02,
    }


def reference(t, params, frequency_embedding_size=256, max_period=10000):
    """Pure-JAX reference (f32 math on the same stored weights, upcast if bf16)."""
    half = frequency_embedding_size // 2
    freqs = jnp.exp(-math.log(max_period) * jnp.arange(half, dtype=jnp.float32) / half)
    args = t.astype(jnp.float32)[:, None] * freqs[None]
    emb = jnp.concatenate([jnp.cos(args), jnp.sin(args)], axis=-1)
    w1 = params["w1"].astype(jnp.float32)
    w2 = params["w2"].astype(jnp.float32)
    h = emb @ w1 + params["b1"].astype(jnp.float32)
    h = h * jax.nn.sigmoid(h)
    return h @ w2 + params["b2"].astype(jnp.float32)


if __name__ == "__main__":
    key = jax.random.PRNGKey(0)
    k_t, k_p = jax.random.split(key)

    hidden_size = 32
    freq_dim = 256
    params = make_params(k_p, hidden_size, freq_dim)

    # Tolerance accounts for bf16 rounding of the matmul operands (accumulation is f32).
    ATOL, RTOL = 2e-3, 2e-2

    # Case 1: N = 8 (sublane-aligned), fractional diffusion-style timesteps.
    N = 8
    t = jax.random.uniform(k_t, (N,), dtype=jnp.float32, minval=0.0, maxval=1000.0)
    out = jax.block_until_ready(timestep_embedder(t, params, frequency_embedding_size=freq_dim))
    ref = reference(t, params, frequency_embedding_size=freq_dim)
    assert out.shape == (N, hidden_size)
    assert jnp.allclose(out, ref, atol=ATOL, rtol=RTOL), "mismatch vs JAX reference (N=8)"

    # Case 2: N = 5 (exercises batch padding / output slicing).
    N2 = 5
    t2 = jax.random.uniform(jax.random.PRNGKey(1), (N2,), dtype=jnp.float32,
                            minval=0.0, maxval=1000.0)
    out2 = jax.block_until_ready(timestep_embedder(t2, params, frequency_embedding_size=freq_dim))
    ref2 = reference(t2, params, frequency_embedding_size=freq_dim)
    assert out2.shape == (N2, hidden_size)
    assert jnp.allclose(out2, ref2, atol=ATOL, rtol=RTOL), "mismatch vs JAX reference (N=5)"

    print("KERNEL_OK")
</pallas_src>

<mosaic_0001>
module attributes {stable_mosaic.version = 11 : i64} {
  func.func @timestep_embedder_kernel(%arg0: i32, %arg1: memref<8x1xf32, #tpu.memory_space<vmem>>, %arg2: memref<1x128xf32, #tpu.memory_space<vmem>>, %arg3: memref<128x128xbf16, #tpu.memory_space<vmem>>, %arg4: memref<128x128xbf16, #tpu.memory_space<vmem>>, %arg5: memref<1x128xf32, #tpu.memory_space<vmem>>, %arg6: memref<128x128xbf16, #tpu.memory_space<vmem>>, %arg7: memref<1x128xf32, #tpu.memory_space<vmem>>, %arg8: memref<8x128xf32, #tpu.memory_space<vmem>>) attributes {dimension_semantics = [#tpu.dimension_semantics<parallel>], iteration_bounds = array<i64: 1>, scalar_prefetch = 0 : i64, scratch_operands = 0 : i64, tpu.core_type = #tpu.core_type<tc>, window_params = [{transform_indices = @transform_0, window_bounds = array<i64: 8, 1>}, {pipeline_mode = #tpu.pipeline_mode<synchronous>, transform_indices = @transform_1, window_bounds = array<i64: 1, 128>}, {pipeline_mode = #tpu.pipeline_mode<synchronous>, transform_indices = @transform_2, window_bounds = array<i64: 128, 128>}, {pipeline_mode = #tpu.pipeline_mode<synchronous>, transform_indices = @transform_3, window_bounds = array<i64: 128, 128>}, {pipeline_mode = #tpu.pipeline_mode<synchronous>, transform_indices = @transform_4, window_bounds = array<i64: 1, 128>}, {pipeline_mode = #tpu.pipeline_mode<synchronous>, transform_indices = @transform_5, window_bounds = array<i64: 128, 128>}, {pipeline_mode = #tpu.pipeline_mode<synchronous>, transform_indices = @transform_6, window_bounds = array<i64: 1, 128>}, {transform_indices = @transform_7, window_bounds = array<i64: 8, 128>}]} {
    %c0 = arith.constant 0 : index
    %c0_0 = arith.constant 0 : index
    %0 = vector.load %arg1[%c0, %c0_0] : memref<8x1xf32, #tpu.memory_space<vmem>>, vector<8x1xf32>
    %c0_1 = arith.constant 0 : index
    %c0_2 = arith.constant 0 : index
    %1 = vector.load %arg2[%c0_1, %c0_2] : memref<1x128xf32, #tpu.memory_space<vmem>>, vector<1x128xf32>
    %2 = vector.broadcast %0 : vector<8x1xf32> to vector<8x128xf32>
    %3 = vector.broadcast %1 : vector<1x128xf32> to vector<8x128xf32>
    %4 = arith.mulf %2, %3 : vector<8x128xf32>
    %5 = math.cos %4 : vector<8x128xf32>
    %6 = arith.truncf %5 : vector<8x128xf32> to vector<8x128xbf16>
    %7 = math.sin %4 : vector<8x128xf32>
    %8 = arith.truncf %7 : vector<8x128xf32> to vector<8x128xbf16>
    %c0_3 = arith.constant 0 : index
    %c0_4 = arith.constant 0 : index
    %9 = vector.load %arg3[%c0_3, %c0_4] : memref<128x128xbf16, #tpu.memory_space<vmem>>, vector<128x128xbf16>
    %cst = arith.constant dense<0.000000e+00> : vector<8x128xf32>
    %10 = tpu.matmul %6, %9, %cst {dimension_numbers = #tpu.dot_dimension_numbers<[1], [0], [0], [1], [0, 0, 1, 1], [], []>} : vector<8x128xbf16>, vector<128x128xbf16>, vector<8x128xf32> -> vector<8x128xf32>
    %c0_5 = arith.constant 0 : index
    %c0_6 = arith.constant 0 : index
    %11 = vector.load %arg4[%c0_5, %c0_6] : memref<128x128xbf16, #tpu.memory_space<vmem>>, vector<128x128xbf16>
    %cst_7 = arith.constant dense<0.000000e+00> : vector<8x128xf32>
    %12 = tpu.matmul %8, %11, %cst_7 {dimension_numbers = #tpu.dot_dimension_numbers<[1], [0], [0], [1], [0, 0, 1, 1], [], []>} : vector<8x128xbf16>, vector<128x128xbf16>, vector<8x128xf32> -> vector<8x128xf32>
    %13 = arith.addf %10, %12 : vector<8x128xf32>
    %c0_8 = arith.constant 0 : index
    %c0_9 = arith.constant 0 : index
    %14 = vector.load %arg5[%c0_8, %c0_9] : memref<1x128xf32, #tpu.memory_space<vmem>>, vector<1x128xf32>
    %15 = vector.broadcast %14 : vector<1x128xf32> to vector<8x128xf32>
    %16 = arith.addf %13, %15 : vector<8x128xf32>
    %17 = arith.negf %16 : vector<8x128xf32>
    %18 = math.exp %17 : vector<8x128xf32>
    %cst_10 = arith.constant 1.000000e+00 : f32
    %19 = vector.broadcast %cst_10 : f32 to vector<8x128xf32>
    %20 = arith.addf %19, %18 : vector<8x128xf32>
    %21 = arith.divf %19, %20 : vector<8x128xf32>
    %22 = arith.mulf %16, %21 : vector<8x128xf32>
    %23 = arith.truncf %22 : vector<8x128xf32> to vector<8x128xbf16>
    %c0_11 = arith.constant 0 : index
    %c0_12 = arith.constant 0 : index
    %24 = vector.load %arg6[%c0_11, %c0_12] : memref<128x128xbf16, #tpu.memory_space<vmem>>, vector<128x128xbf16>
    %cst_13 = arith.constant dense<0.000000e+00> : vector<8x128xf32>
    %25 = tpu.matmul %23, %24, %cst_13 {dimension_numbers = #tpu.dot_dimension_numbers<[1], [0], [0], [1], [0, 0, 1, 1], [], []>} : vector<8x128xbf16>, vector<128x128xbf16>, vector<8x128xf32> -> vector<8x128xf32>
    %c0_14 = arith.constant 0 : index
    %c0_15 = arith.constant 0 : index
    %26 = vector.load %arg7[%c0_14, %c0_15] : memref<1x128xf32, #tpu.memory_space<vmem>>, vector<1x128xf32>
    %27 = vector.broadcast %26 : vector<1x128xf32> to vector<8x128xf32>
    %28 = arith.addf %25, %27 : vector<8x128xf32>
    %c0_16 = arith.constant 0 : index
    %c0_17 = arith.constant 0 : index
    %29 = vector.load %arg8[%c0_16, %c0_17] : memref<8x128xf32, #tpu.memory_space<vmem>>, vector<8x128xf32>
    tpu.vector_store %arg8[%c0_16, %c0_17], %28 {strides = array<i32>} : memref<8x128xf32, #tpu.memory_space<vmem>>, vector<8x128xf32>,
    return
  }
  func.func @transform_0(%arg0: i32) -> (i32, i32) {
    %c0_i32 = arith.constant 0 : i32
    %c0_i32_0 = arith.constant 0 : i32
    return %arg0, %c0_i32 : i32, i32
  }
  func.func @transform_1(%arg0: i32) -> (i32, i32) {
    %c0_i32 = arith.constant 0 : i32
    %c0_i32_0 = arith.constant 0 : i32
    %c0_i32_1 = arith.constant 0 : i32
    return %c0_i32, %c0_i32_0 : i32, i32
  }
  func.func @transform_2(%arg0: i32) -> (i32, i32) {
    %c0_i32 = arith.constant 0 : i32
    %c0_i32_0 = arith.constant 0 : i32
    %c0_i32_1 = arith.constant 0 : i32
    return %c0_i32, %c0_i32_0 : i32, i32
  }
  func.func @transform_3(%arg0: i32) -> (i32, i32) {
    %c0_i32 = arith.constant 0 : i32
    %c0_i32_0 = arith.constant 0 : i32
    %c0_i32_1 = arith.constant 0 : i32
    return %c0_i32, %c0_i32_0 : i32, i32
  }
  func.func @transform_4(%arg0: i32) -> (i32, i32) {
    %c0_i32 = arith.constant 0 : i32
    %c0_i32_0 = arith.constant 0 : i32
    %c0_i32_1 = arith.constant 0 : i32
    return %c0_i32, %c0_i32_0 : i32, i32
  }
  func.func @transform_5(%arg0: i32) -> (i32, i32) {
    %c0_i32 = arith.constant 0 : i32
    %c0_i32_0 = arith.constant 0 : i32
    %c0_i32_1 = arith.constant 0 : i32
    return %c0_i32, %c0_i32_0 : i32, i32
  }
  func.func @transform_6(%arg0: i32) -> (i32, i32) {
    %c0_i32 = arith.constant 0 : i32
    %c0_i32_0 = arith.constant 0 : i32
    %c0_i32_1 = arith.constant 0 : i32
    return %c0_i32, %c0_i32_0 : i32, i32
  }
  func.func @transform_7(%arg0: i32) -> (i32, i32) {
    %c0_i32 = arith.constant 0 : i32
    %c0_i32_0 = arith.constant 0 : i32
    return %arg0, %c0_i32 : i32, i32
  }
}

</mosaic_0001>

<bundles_post_ra>
// kernel: tpu_custom_call.1
= control target key start
LH: loop header
LB: loop body
LE: loop exit
PB: predicated region body
PF: predicated region fallthrough
CT: control target
= control target key end

     0   :  { %12 = vsyncpa [#allocation3], 0  ;;  %s1073_s0 = inlined_call_operand.vmem [shape: f32[8,1], index: 0, kind: input, shape index: {}]   ;;  %s1074_s1 = inlined_call_operand.vmem [shape: f32[1,128], index: 1, kind: input, shape index: {}]   ;;  %s1075_s2 = inlined_call_operand.hbm [shape: bf16[128,128], index: 2, kind: input, shape index: {}]   ;;  %s1076_s3 = inlined_call_operand.hbm [shape: bf16[128,128], index: 3, kind: input, shape index: {}]   ;;  %s1077_s4 = inlined_call_operand.vmem [shape: f32[1,128], index: 4, kind: input, shape index: {}]   ;;  %s1078_s5 = inlined_call_operand.hbm [shape: bf16[128,128], index: 5, kind: input, shape index: {}]   ;;  %s1079_s6 = inlined_call_operand.vmem [shape: f32[1,128], index: 6, kind: input, shape index: {}]   ;;  %s1080_s7 = inlined_call_operand.hbm [shape: f32[8,128], index: 7, kind: output, shape index: {}]  }
   0x1   :  { %13 = vsyncpa [#allocation6], 0 }
   0x2   :  { %14 = vsyncpa [#allocation4], 0  ;;  %s36_s26 = sshll.u32 %s1076_s3, 4  ;;  %s926_s27 = smov [#allocation5]   ;;  %s37_s26 = int_to_ptr.hbm [resolvable:$true] %s36_s26 }
   0x3   :  { %s38_s28 = sshll.u32 %s926_s27, 4  ;;  %s23_s8 = sshll.u32 %s1075_s2, 4  ;;  %s39_s28 = int_to_ptr.vmem [resolvable:$true] %s38_s28  ;;  %s24_s8 = int_to_ptr.hbm [resolvable:$true] %s23_s8 }
   0x4   :  { %s927_s9 = smov 64   ;;  %s928_s10 = smov 4  }
   0x5   :  { %44 = dma.hbm_to_vmem [thread:$0]  %s37_s26, 1024, %s39_s28, [#allocation6], %s927_s9, %s927_s9, %s928_s10  }
   0x6   :  { %s929_s11 = smov [#allocation2]   ;;  %s51_s15 = sshll.u32 %s1078_s5, 4  ;;  %s52_s15 = int_to_ptr.hbm [resolvable:$true] %s51_s15 }
   0x7   :  { %s25_s12 = sshll.u32 %s929_s11, 4  ;;  %s930_s3 = smov [#allocation7]   ;;  %s26_s12 = int_to_ptr.vmem [resolvable:$true] %s25_s12 }
   0x8   :  { %31 = dma.hbm_to_vmem [thread:$0]  %s24_s8, 1024, %s26_s12, [#allocation3], %s927_s9, %s927_s9, %s928_s10  }
   0x9   :  { %s53_s16 = sshll.u32 %s930_s3, 4  ;;  %s54_s16 = int_to_ptr.vmem [resolvable:$true] %s53_s16 }
   0xa   :  { %59 = dma.hbm_to_vmem [thread:$0]  %s52_s15, 1024, %s54_s16, [#allocation6], %s927_s9, %s927_s9, %s928_s10  }
   0xb   :  { %920 = dma.done.wait [#allocation3], 1024  }
   0xc   :  { %921 = vsyncadd [#allocation3], 4294966272 }
   0xd   :  { %922 = dma.done.wait [#allocation6], 2048  }
   0xe   :  { %923 = vsyncadd [#allocation6], 4294965248  ;;  %v931_v0 = vmov 0   ;;  %v74_v1 = vld [vmem:[%s1073_s0] sm:$0xff]  ;;  %v794_v3 = vld [vmem:[#allocation5 + $0x38] sm:$0xff]  ;;  %s938_s20 = smov [#allocation8]  }
   0xf   :  { %816 = vset.pattern.permute.xlu0 %v931_v0  ;;  %v817_v2 = vld [vmem:[%s1074_s1] ss:$0 sm:$0xff]  ;;  %v786_v4 = vld [vmem:[#allocation2 + $0x38] sm:$0xff]  ;;  %476 = vmatpush.bf16.msra.mxu0 %v794_v3  ;;  %v793_v7 = vld [vmem:[#allocation5 + $0x30] sm:$0xff]  ;;  %v932_v26 = vmov 683565275  }
  0x10   :  { %78 = vperm.xlu0 %816, %v74_v1   ;;  %537 = vmatpush.bf16.msra.mxu1 %v786_v4  ;;  %v785_v8 = vld [vmem:[#allocation2 + $0x30] sm:$0xff]  ;;  %v792_v11 = vld [vmem:[#allocation5 + $0x28] sm:$0xff]  ;;  %v791_v16 = vld [vmem:[#allocation5 + $0x20] sm:$0xff]  ;;  %v933_v28 = vmov 2475754826   ;;  %s663_s21 = sshll.u32 %s938_s20, 4  ;;  %s664_s21 = int_to_ptr.vmem [resolvable:$true] %s663_s21 }
  0x11   :  { %v784_v12 = vld [vmem:[#allocation2 + $0x28] sm:$0xff]  ;;  %v783_v17 = vld [vmem:[#allocation2 + $0x20] sm:$0xff]  ;;  %v790_v21 = vld [vmem:[#allocation5 + $0x18] sm:$0xff]  ;;  %v934_v31 = vmov 2131351028   ;;  %s665_s24 = sshll.u32 %s1080_s7, 4  ;;  %s666_s24 = int_to_ptr.hbm [resolvable:$true] %s665_s24 }
  0x12   :  { %v782_v22 = vld [vmem:[#allocation2 + $0x18] sm:$0xff]  ;;  %v935_v34 = vmov 2102212464   ;;  %v789_v36 = vld [vmem:[#allocation5 + $0x10] sm:$0xff]  ;;  %v936_v38 = vmov 920167782  }
  0x13   :  { %477 = vmatpush.bf16.msra.mxu0 %v793_v7  ;;  %v937_v41 = vmov 1326507024   ;;  %v781_v43 = vld [vmem:[#allocation2 + $0x10] sm:$0xff]  ;;  %v788_v52 = vld [vmem:[#allocation5 + $0x8] sm:$0xff]  ;;  %v779_v4 = vld [vmem:[#allocation2] sm:$0xff] }
  0x14   :  { %538 = vmatpush.bf16.msra.mxu1 %v785_v8  ;;  %v780_v55 = vld [vmem:[#allocation2 + $0x8] sm:$0xff] }
  0x17   :  { %478 = vmatpush.bf16.msra.mxu0 %v792_v11 }
  0x18   :  { %539 = vmatpush.bf16.msra.mxu1 %v784_v12 }
  0x1b   :  { %479 = vmatpush.bf16.msra.mxu0 %v791_v16 }
  0x1c   :  { %540 = vmatpush.bf16.msra.mxu1 %v783_v17 }
  0x1f   :  { %480 = vmatpush.bf16.msra.mxu0 %v790_v21 }
  0x20   :  { %541 = vmatpush.bf16.msra.mxu1 %v782_v22 }
  0x23   :  { %481 = vmatpush.bf16.msra.mxu0 %v789_v36 }
  0x24   :  { %542 = vmatpush.bf16.msra.mxu1 %v781_v43 }
  0x27   :  { %482 = vmatpush.bf16.msra.mxu0 %v788_v52 }
  0x28   :  { %543 = vmatpush.bf16.msra.mxu1 %v780_v55 }
  0x2c   :  { %544 = vmatpush.bf16.msra.mxu1 %v779_v4 }
  0x82   :  { %v79_v5 = vpop.permute.xlu0 %78 }
  0x83   :  { %v995_v6 = vmul.f32 %v817_v2, %v79_v5  ;;  %v787_v2 = vld [vmem:[#allocation5] sm:$0xff] }
  0x84   :  { %483 = vmatpush.bf16.msra.mxu0 %v787_v2 }
  0x85   :  { %v88_v9 = vand.u32 2139095040, %v995_v6  ;;  %v85_v14 = vand.u32 2147483647, %v995_v6  ;;  %vm87_vm12 = vcmp.lt.s32.totalorder %v995_v6, 0 }
  0x87   :  { %v89_v10 = vshrl.u32 %v88_v9, 23  ;;  %v92_v18 = vand.u32 8388607, %v85_v14  ;;  %vm86_vm13 = vcmp.le.f32.partialorder %v85_v14, 0.7853982 }
  0x89   :  { %v676_v13 = vadd.s32 4294967169, %v89_v10  ;;  %v93_v24 = vor.u32 8388608, %v92_v18 }
  0x8b   :  { %v95_v15 = vadd.s32 1, %v676_v13  ;;  %v1016_v49 = vshll.u32 %v93_v24, 8 }
  0x8d   :  { %vm96_vm0 = vcmp.gt.s32.totalorder %v95_v15, 0  ;;  %v134_v60 = vand.u32 65535, %v1016_v49  ;;  %v135_v3 = vshrl.u32 %v1016_v49, 16 }
  0x8e   :  { %v97_v19 = vsel %vm96_vm0, %v95_v15, 0 }
  0x8f   :  { %v99_v20 = vand.u32 31, %v97_v19  ;;  %v1003_v25 = vshrl.u32 %v97_v19, 5 }
  0x91   :  { %v1001_v23 = vsub.s32 32, %v99_v20  ;;  %v102_v27 = vshll.u32 %v932_v26, %v99_v20  ;;  %v105_v29 = vshll.u32 %v933_v28, %v99_v20  ;;  %v108_v33 = vshll.u32 %v934_v31, %v99_v20 }
  0x92   :  { %v111_v37 = vshll.u32 %v935_v34, %v99_v20  ;;  %v114_v40 = vshll.u32 %v936_v38, %v99_v20  ;;  %vm117_vm1 = vcmp.lt.s32.totalorder %v1003_v25, 1  ;;  %vm120_vm2 = vcmp.lt.s32.totalorder %v1003_v25, 4 }
  0x93   :  { %v103_v30 = vshrl.u32 %v933_v28, %v1001_v23  ;;  %v106_v32 = vshrl.u32 %v934_v31, %v1001_v23  ;;  %v109_v35 = vshrl.u32 %v935_v34, %v1001_v23  ;;  %v112_v39 = vshrl.u32 %v936_v38, %v1001_v23 }
  0x94   :  { %v115_v42 = vshrl.u32 %v937_v41, %v1001_v23  ;;  %vm119_vm3 = vcmp.lt.s32.totalorder %v1003_v25, 3  ;;  %vm118_vm4 = vcmp.lt.s32.totalorder %v1003_v25, 2 }
  0x95   :  { %v1011_v44 = vor.u32 %v103_v30, %v102_v27  ;;  %v1013_v45 = vor.u32 %v106_v32, %v105_v29  ;;  %v110_v46 = vor.u32 %v109_v35, %v108_v33  ;;  %v113_v47 = vor.u32 %v112_v39, %v111_v37 }
  0x96   :  { %v116_v48 = vor.u32 %v115_v42, %v114_v40  ;;  %v101_v29 = vshrl.u32 %v932_v26, %v1001_v23 }
  0x97   :  { %v125_v50 = vsel %vm117_vm1, %v1011_v44, %v1013_v45  ;;  %v129_v51 = vsel %vm117_vm1, %v1013_v45, %v110_v46  ;;  %v126_v53 = vsel %vm120_vm2, %v113_v47, 920167782  ;;  %v122_v21 = vsel %vm120_vm2, %v110_v46, 2102212464 }
  0x98   :  { %v130_v54 = vsel %vm120_vm2, %v116_v48, 1326507024  ;;  %v127_v56 = vsel %vm119_vm3, %v110_v46, %v126_v53  ;;  %v121_v36 = vsel %vm117_vm1, %v101_v29, %v1011_v44  ;;  %v123_v37 = vsel %vm119_vm3, %v1013_v45, %v122_v21 }
  0x99   :  { %v131_v57 = vsel %vm119_vm3, %v113_v47, %v130_v54  ;;  %v128_v58 = vsel %vm118_vm4, %v125_v50, %v127_v56  ;;  %v124_v26 = vsel %vm118_vm4, %v121_v36, %v123_v37 }
  0x9a   :  { %v132_v59 = vsel %vm118_vm4, %v129_v51, %v131_v57  ;;  %v158_v63 = vand.u32 65535, %v128_v58  ;;  %v159_v1 = vshrl.u32 %v128_v58, 16  ;;  %v178_v46 = vmul.u32 %v1016_v49, %v124_v26 }
  0x9b   :  { %v136_v61 = vand.u32 65535, %v132_v59  ;;  %v137_v62 = vshrl.u32 %v132_v59, 16  ;;  %vm228_vm4 = vweird.f32 %v995_v6 }
  0x9c   :  { %v161_v7 = vmul.u32 %v159_v1, %v134_v60  ;;  %v162_v9 = vmul.u32 %v158_v63, %v135_v3  ;;  %v160_v12 = vmul.u32 %v158_v63, %v134_v60  ;;  %v163_v16 = vmul.u32 %v159_v1, %v135_v3 }
  0x9d   :  { %v139_v5 = vmul.u32 %v137_v62, %v134_v60  ;;  %v140_v8 = vmul.u32 %v136_v61, %v135_v3  ;;  %v138_v10 = vmul.u32 %v136_v61, %v134_v60  ;;  %v141_v15 = vmul.u32 %v137_v62, %v135_v3 }
  0x9e   :  { %v164_v13 = vshll.u32 %v161_v7, 16  ;;  %v166_v18 = vshll.u32 %v162_v9, 16  ;;  %v165_v34 = vshrl.u32 %v161_v7, 16  ;;  %v167_v40 = vshrl.u32 %v162_v9, 16 }
  0x9f   :  { %v142_v11 = vshll.u32 %v139_v5, 16  ;;  %v144_v17 = vshll.u32 %v140_v8, 16  ;;  %v143_v32 = vshrl.u32 %v139_v5, 16  ;;  %v145_v38 = vshrl.u32 %v140_v8, 16 }
  0xa0   :  { %vm168_vm6 = vc.u32 %v160_v12, %v164_v13  ;;  %v170_v20 = vadd.s32 %v164_v13, %v160_v12 }
  0xa1   :  { %vm146_vm5 = vc.u32 %v138_v10, %v142_v11  ;;  %v148_v19 = vadd.s32 %v142_v11, %v138_v10  ;;  %v169_v24 = vsel %vm168_vm6, 1, %v931_v0 }
  0xa2   :  { %v147_v22 = vsel %vm146_vm5, 1, %v931_v0  ;;  %v171_v28 = vadd.s32 %v169_v24, %v163_v16  ;;  %vm172_vm8 = vc.u32 %v170_v20, %v166_v18  ;;  %v174_v41 = vadd.s32 %v170_v20, %v166_v18 }
  0xa3   :  { %v149_v27 = vadd.s32 %v147_v22, %v141_v15  ;;  %vm150_vm7 = vc.u32 %v148_v19, %v144_v17  ;;  %v173_v31 = vsel %vm172_vm8, 1, %v931_v0 }
  0xa4   :  { %v151_v30 = vsel %vm150_vm7, 1, %v931_v0  ;;  %v175_v35 = vadd.s32 %v173_v31, %v171_v28 }
  0xa5   :  { %v153_v33 = vadd.s32 %v151_v30, %v149_v27 }
  0xa6   :  { %v176_v23 = vadd.s32 %v175_v35, %v165_v34 }
  0xa7   :  { %v154_v39 = vadd.s32 %v153_v33, %v143_v32 }
  0xa8   :  { %v177_v42 = vadd.s32 %v176_v23, %v167_v40 }
  0xa9   :  { %v155_v0 = vadd.s32 %v154_v39, %v145_v38 }
  0xaa   :  { %v181_v43 = vadd.s32 1, %v177_v42 }
  0xab   :  { %vm180_vm9 = vc.u32 %v155_v0, %v174_v41  ;;  %v179_v56 = vadd.s32 %v174_v41, %v155_v0  ;;  %v802_v0 = vld [vmem:[#allocation7 + $0x38] sm:$0xff]  ;;  %v801_v41 = vld [vmem:[#allocation7 + $0x30] sm:$0xff] }
  0xac   :  { %v182_v47 = vsel %vm180_vm9, %v181_v43, %v177_v42  ;;  %644 = vmatpush.bf16.msra.mxu2 %v802_v0  ;;  %v800_v42 = vld [vmem:[#allocation7 + $0x28] sm:$0xff]  ;;  %v799_v43 = vld [vmem:[#allocation7 + $0x20] sm:$0xff] }
  0xad   :  { %v183_v44 = vadd.s32 %v182_v47, %v178_v46  ;;  %v798_v46 = vld [vmem:[#allocation7 + $0x18] sm:$0xff]  ;;  %v797_v47 = vld [vmem:[#allocation7 + $0x10] sm:$0xff] }
  0xaf   :  { %v184_v48 = vadd.s32 536870912, %v183_v44 }
  0xb0   :  { %645 = vmatpush.bf16.msra.mxu2 %v801_v41 }
  0xb1   :  { %v185_v50 = vshrl.u32 %v184_v48, 30 }
  0xb3   :  { %v186_v51 = vshll.u32 %v185_v50, 30  ;;  %v209_v7 = vsub.s32 4, %v185_v50 }
  0xb4   :  { %646 = vmatpush.bf16.msra.mxu2 %v800_v42 }
  0xb5   :  { %v187_v45 = vsub.s32 %v183_v44, %v186_v51  ;;  %v210_v12 = vsel %vm87_vm12, %v209_v7, %v185_v50  ;;  %v818_v44 = vld [vmem:[%s1077_s4] ss:$0 sm:$0xff] }
  0xb6   :  { %v212_v16 = vsel %vm86_vm13, 0, %v210_v12  ;;  %v795_v51 = vld [vmem:[#allocation7] sm:$0xff] }
  0xb7   :  { %vm188_vm10 = vcmp.lt.s32.totalorder %v187_v45, 0  ;;  %v189_v52 = vsub.s32 0, %v187_v45  ;;  %v384_v21 = vadd.s32 3, %v212_v16  ;;  %v229_v28 = vand.u32 3, %v212_v16 }
  0xb8   :  { %647 = vmatpush.bf16.msra.mxu2 %v799_v43 }
  0xb9   :  { %v190_v53 = vsel %vm188_vm10, %v189_v52, %v187_v45  ;;  %v385_v29 = vand.u32 3, %v384_v21  ;;  %vm230_vm14 = vcmp.lt.s32.totalorder %v229_v28, 2  ;;  %vm231_vm15 = vcmp.eq.s32.totalorder %v229_v28, 0 }
  0xba   :  { %v191_v54 = vclz %v190_v53  ;;  %vm234_vm3 = vcmp.eq.s32.totalorder %v229_v28, 2 }
  0xbb   :  { %vm386_vm0 = vcmp.lt.s32.totalorder %v385_v29, 2  ;;  %vm387_vm1 = vcmp.eq.s32.totalorder %v385_v29, 0  ;;  %vm390_vm2 = vcmp.eq.s32.totalorder %v385_v29, 2 }
  0xbc   :  { %v677_v55 = vadd.s32 4294967294, %v191_v54  ;;  %648 = vmatpush.bf16.msra.mxu2 %v798_v46 }
  0xbe   :  { %vm678_vm11 = vcmp.lt.s32.totalorder %v677_v55, 0 }
  0xbf   :  { %v194_v25 = vsel %vm678_vm11, 0, %v677_v55 }
  0xc0   :  { %v195_v57 = vsub.s32 32, %v194_v25  ;;  %v199_v58 = vsub.s32 4294967266, %v194_v25  ;;  %v196_v59 = vshll.u32 %v187_v45, %v194_v25  ;;  %649 = vmatpush.bf16.msra.mxu2 %v797_v47 }
  0xc2   :  { %v197_v60 = vshrl.u32 %v179_v56, %v195_v57  ;;  %v200_v61 = vadd.s32 127, %v199_v58 }
  0xc4   :  { %v198_v49 = vor.u32 %v197_v60, %v196_v59  ;;  %v201_v62 = vshll.u32 %v200_v61, 23 }
  0xc6   :  { %v202_v63 = vor.u32 4788187, %v201_v62  ;;  %v205_v2 = vcvt.s32.f32 %v198_v49 }
  0xc8   :  { %v203_v1 = vand.u32 2147483647, %v202_v63 }
  0xca   :  { %v206_v3 = vmul.f32 %v205_v2, %v203_v1 }
  0xcc   :  { %v207_v4 = vxor.u32 2147483648, %v206_v3 }
  0xce   :  { %v208_v5 = vsel %vm87_vm12, %v207_v4, %v206_v3 }
  0xcf   :  { %v211_v8 = vsel %vm86_vm13, %v995_v6, %v208_v5  ;;  %v796_v6 = vld [vmem:[#allocation7 + $0x8] sm:$0xff]  ;;  %v819_v5 = vld [vmem:[%s1079_s6] ss:$0 sm:$0xff] }
  0xd0   :  { %v213_v9 = vmul.f32 %v211_v8, %v211_v8  ;;  %650 = vmatpush.bf16.msra.mxu2 %v796_v6 }
  0xd2   :  { %v214_v10 = vmul.f32 -0.001358992, %v213_v9  ;;  %v221_v11 = vmul.f32 -0.00019511016, %v213_v9 }
  0xd4   :  { %v215_v13 = vadd.f32 0.041655596, %v214_v10  ;;  %v222_v15 = vadd.f32 0.008332121, %v221_v11  ;;  %651 = vmatpush.bf16.msra.mxu2 %v795_v51 }
  0xd6   :  { %v216_v17 = vmul.f32 %v215_v13, %v213_v9  ;;  %v223_v18 = vmul.f32 %v222_v15, %v213_v9 }
  0xd8   :  { %v217_v19 = vadd.f32 -0.4999988, %v216_v17  ;;  %v224_v20 = vadd.f32 -0.16666654, %v223_v18 }
  0xda   :  { %v218_v22 = vmul.f32 %v217_v19, %v213_v9  ;;  %v225_v24 = vmul.f32 %v224_v20, %v213_v9 }
  0xdc   :  { %v219_v27 = vadd.f32 1.0, %v218_v22  ;;  %v226_v14 = vadd.f32 1.0, %v225_v24 }
  0xde   :  { %v227_v30 = vmul.f32 %v226_v14, %v211_v8  ;;  %v235_v31 = vxor.u32 2147483648, %v219_v27 }
  0xe0   :  { %v232_v32 = vxor.u32 2147483648, %v227_v30  ;;  %v392_v34 = vsel %vm390_vm2, %v235_v31, %v227_v30  ;;  %v236_v36 = vsel %vm234_vm3, %v235_v31, %v227_v30 }
  0xe2   :  { %v389_v33 = vsel %vm387_vm1, %v219_v27, %v232_v32  ;;  %v233_v35 = vsel %vm231_vm15, %v219_v27, %v232_v32 }
  0xe3   :  { %v393_v37 = vsel %vm386_vm0, %v389_v33, %v392_v34  ;;  %v237_v38 = vsel %vm230_vm14, %v233_v35, %v236_v36 }
  0xe4   :  { %v394_v39 = vsel %vm228_vm4, nan, %v393_v37  ;;  %v238_v40 = vsel %vm228_vm4, nan, %v237_v38 }
  0xe5   :  { %v395_v23 = vpack.c.bf16 %v394_v39, %v394_v39  ;;  %v239_v26 = vpack.c.bf16 %v238_v40, %v238_v40 }
  0xe7   :  { %484 = vmatmul.bf16.vlgmr.msra.gmra.mxu0 %v395_v23  ;;  %545 = vmatmul.bf16.vlgmr.msra.gmra.mxu1 %v239_v26 }
 0x164   :  { %v485_v48 = vpop.f32.mrf.mxu0  ;;  %v546_v50 = vpop.f32.mrf.mxu1 }
 0x165   :  { %v547_v45 = vadd.f32 %v546_v50, %v485_v48 }
 0x167   :  { %v554_v52 = vadd.f32 %v818_v44, %v547_v45 }
 0x169   :  { %v746_v53 = vmul.f32 -1.442695, %v554_v52 }
 0x16b   :  { %820 = vpow2.f32 %v746_v53 }
 0x16c   :  { %v487_v54 = vpop.f32.mrf.mxu0  ;;  %v548_v55 = vpop.f32.mrf.mxu1 }
 0x171   :  { %v821_v25 = vpop.eup %820 }
 0x172   :  { %v558_v56 = vadd.f32 1.0, %v821_v25 }
 0x174   :  { %822 = vrcp.f32 %v558_v56  ;;  %v570_v60 = vand.u32 2147483648, %v558_v56  ;;  %v568_v49 = vand.u32 2147483647, %v558_v56  ;;  %vm564_vm6 = vweird.f32 %v558_v56 }
 0x176   :  { %v571_v63 = vor.u32 1.1754944e-38, %v570_v60  ;;  %vm569_vm8 = vcmp.eq.f32.partialorder %v568_v49, 8.507059e+37 }
 0x17a   :  { %v823_v57 = vpop.eup %822 }
 0x17b   :  { %v560_v58 = vmul.f32 %v823_v57, %v558_v56  ;;  %vm565_vm5 = vweird.f32 %v823_v57 }
 0x17c   :  { %vm566_vm7 = vmor %vm564_vm6, %vm565_vm5 }
 0x17d   :  { %v561_v59 = vsub.f32 1.0, %v560_v58 }
 0x17f   :  { %v562_v61 = vmul.f32 %v823_v57, %v561_v59 }
 0x181   :  { %v563_v62 = vadd.f32 %v823_v57, %v562_v61 }
 0x183   :  { %v567_v1 = vsel %vm566_vm7, %v823_v57, %v563_v62 }
 0x184   :  { %v572_v2 = vsel %vm569_vm8, %v571_v63, %v567_v1 }
 0x185   :  { %v574_v3 = vmul.f32 %v572_v2, %v554_v52 }
 0x187   :  { %v575_v4 = vpack.c.bf16 %v574_v3, %v574_v3 }
 0x189   :  { %652 = vmatmul.bf16.vlgmr.msra.gmra.mxu2 %v575_v4 }
 0x20c   :  { %v653_v7 = vpop.f32.mrf.mxu2 }
 0x20d   :  { %v654_v8 = vadd.f32 %v819_v5, %v653_v7 }
 0x20f   :  { %657 = vst [vmem:[#allocation8] sm:$0xff] %v654_v8 }
 0x210   :  { %668 = dma.vmem_to_hbm [thread:$0]  %s664_s21, 128, %s666_s24, [#allocation4]  }
 0x214   :  { %v655_v9 = vpop.f32.mrf.mxu2 }
 0x215   :  { %924 = dma.done.wait [#allocation4], 128  }
 0x216   :  { %925 = vsyncadd [#allocation4], 4294967168 }
 0x217   :  { %673 = vsyncpa [#allocation3], 1 }
 0x218   :  { %674 = vsyncpa [#allocation6], 1 }
 0x219   :  { %675 = vsyncpa [#allocation4], 1 }

</bundles_post_ra>
